<compile_context>
chip_gen: v5e
topology: v5e:2x2
jax: 0.10.0
libtpu: 0.0.40
codegen_flags: <defaults>
</compile_context>

<pallas_src>
import functools
import math

import jax
import jax.numpy as jnp
from jax.experimental import pallas as pl
from jax.experimental.pallas import tpu as pltpu

_LANE = 128
_EPS = 1e-8


def _ceil_div(a, b):
    return -(-a // b)


def _round_up(a, b):
    return _ceil_div(a, b) * b


def _nmse_kernel(yp_ref, yt_ref, mse_out_ref, den_out_ref,
                 acc_mse_ref, acc_den_ref, *,
                 rows, tiles_per_chunk, need_mask):
    c = pl.program_id(0)           # parallel chunk axis
    i = pl.program_id(1)           # arbitrary (reduction) tile axis

    @pl.when(i == 0)
    def _():
        acc_mse_ref[...] = jnp.zeros_like(acc_mse_ref)
        acc_den_ref[...] = jnp.zeros_like(acc_den_ref)

    yp = yp_ref[...].astype(jnp.float32)
    yt = yt_ref[...].astype(jnp.float32)
    diff = yp - yt
    sq_err = diff * diff
    sq_true = yt * yt

    tn = yp.shape[0]
    tile_idx = c * tiles_per_chunk + i

    def _accumulate(se, st):
        # Pure vreg adds; sublane + cross-lane reductions deferred to wrapper.
        acc_mse_ref[...] += se.reshape(-1, 8, _LANE).sum(axis=0)
        acc_den_ref[...] += st.reshape(-1, 8, _LANE).sum(axis=0)

    if need_mask:
        # Only tiles at/after this index can touch out-of-bounds rows, so the
        # iota/compare/select work is gated off the hot path.
        ragged_first = rows // tn

        @pl.when(tile_idx < ragged_first)
        def _():
            _accumulate(sq_err, sq_true)

        @pl.when(tile_idx >= ragged_first)
        def _():
            row_ids = (jax.lax.broadcasted_iota(jnp.int32, sq_err.shape, 0)
                       + tile_idx * tn)
            valid = row_ids < rows
            _accumulate(jnp.where(valid, sq_err, 0.0),
                        jnp.where(valid, sq_true, 0.0))
    else:
        _accumulate(sq_err, sq_true)

    @pl.when(i == pl.num_programs(1) - 1)
    def _():
        mse_out_ref[...] = acc_mse_ref[...].reshape(mse_out_ref.shape)
        den_out_ref[...] = acc_den_ref[...].reshape(den_out_ref.shape)


def nmse_loss(y_pred, y_true, *, row_tile=8192, num_chunks=None):
    """Normalized MSE: sum((y_pred - y_true)^2) / (sum(y_true^2) + 1e-8)."""
    assert y_pred.shape == y_true.shape
    total = math.prod(y_pred.shape) if y_pred.shape else 1

    yp = y_pred.reshape(-1)
    yt = y_true.reshape(-1)

    aligned = (total // _LANE) * _LANE
    tail_mse = jnp.float32(0.0)
    tail_den = jnp.float32(0.0)
    if aligned == 0:
        # Tiny input (< 128 elements): pad a single lane row (negligible copy).
        pad = _LANE - total
        yp = jnp.pad(yp, (0, pad))
        yt = jnp.pad(yt, (0, pad))
        aligned = _LANE
    elif aligned != total:
        # Fold the (< 128 element) tail in with a tiny wrapper-side correction
        # instead of materializing a padded copy of both inputs in HBM.
        tp = yp[aligned:].astype(jnp.float32)
        tt = yt[aligned:].astype(jnp.float32)
        tail_mse = jnp.sum((tp - tt) ** 2)
        tail_den = jnp.sum(tt * tt)
        yp = yp[:aligned]
        yt = yt[:aligned]

    rows = aligned // _LANE
    yp2 = yp.reshape(rows, _LANE)
    yt2 = yt.reshape(rows, _LANE)

    # Dtype-aware minimum sublane multiple: 8 (4B), 16 (2B), 32 (1B).
    isz_p = jnp.dtype(y_pred.dtype).itemsize
    isz_t = jnp.dtype(y_true.dtype).itemsize
    sub = max(8, 32 // max(1, min(isz_p, isz_t)))

    # Cap the per-kernel tile footprint (2 inputs x 2 pipeline buffers) at
    # ~32 MiB so big tiles fit every generation, including v7x (64 MiB VMEM).
    bytes_per_row = 2 * _LANE * (isz_p + isz_t)          # 2 buffers per input
    max_tile_rows = max(sub, (32 * 1024 * 1024) // bytes_per_row)
    row_tile = _round_up(max(sub, min(row_tile, max_tile_rows)), sub)

    tn = min(row_tile, _round_up(rows, sub))
    n_tiles = _ceil_div(rows, tn)

    if num_chunks is None:
        # Outer parallel axis: engages both v7x TensorCores; harmless on v5e/v6e.
        num_chunks = 2 if n_tiles >= 4 else 1
    num_chunks = max(1, min(num_chunks, n_tiles))
    tiles_per_chunk = _ceil_div(n_tiles, num_chunks)

    need_mask = (rows % tn != 0) or (num_chunks * tiles_per_chunk != n_tiles)
    last_tile = n_tiles - 1

    def in_map(c, i):
        # Clamp so phantom tile slots (at the very end of the last chunk) never
        # index past the array; their contribution is zeroed by the mask.
        return (jnp.minimum(c * tiles_per_chunk + i, last_tile), 0)

    kernel = functools.partial(_nmse_kernel, rows=rows,
                               tiles_per_chunk=tiles_per_chunk,
                               need_mask=need_mask)

    footprint = tn * bytes_per_row
    vmem_limit = int(min(48 * 1024 * 1024,
                         max(32 * 1024 * 1024, footprint + (4 << 20))))

    mse_parts, den_parts = pl.pallas_call(
        kernel,
        out_shape=(
            jax.ShapeDtypeStruct((num_chunks, 8, _LANE), jnp.float32),
            jax.ShapeDtypeStruct((num_chunks, 8, _LANE), jnp.float32),
        ),
        grid_spec=pltpu.PrefetchScalarGridSpec(
            num_scalar_prefetch=0,
            grid=(num_chunks, tiles_per_chunk),
            in_specs=[
                pl.BlockSpec((tn, _LANE), in_map),
                pl.BlockSpec((tn, _LANE), in_map),
            ],
            out_specs=[
                pl.BlockSpec((1, 8, _LANE), lambda c, i: (c, 0, 0)),
                pl.BlockSpec((1, 8, _LANE), lambda c, i: (c, 0, 0)),
            ],
            scratch_shapes=[
                pltpu.VMEM((8, _LANE), jnp.float32),   # per-lane mse partials
                pltpu.VMEM((8, _LANE), jnp.float32),   # per-lane denom partials
            ],
        ),
        compiler_params=pltpu.CompilerParams(
            dimension_semantics=("parallel", "arbitrary"),
            vmem_limit_bytes=vmem_limit,
        ),
    )(yp2, yt2)

    mse = jnp.sum(mse_parts) + tail_mse
    den = jnp.sum(den_parts) + tail_den
    return mse / (den + _EPS)


def _reference(y_pred, y_true):
    yp = y_pred.astype(jnp.float32)
    yt = y_true.astype(jnp.float32)
    return jnp.sum((yp - yt) ** 2) / (jnp.sum(yt ** 2) + 1e-8)


if __name__ == "__main__":
    key = jax.random.PRNGKey(0)
    k1, k2, k3, k4, k5, k6, k7, k8 = jax.random.split(key, 8)

    # Primary example: small NCHW-shaped inputs (lane-aligned, single tile).
    y_pred = jax.random.normal(k1, (2, 4, 16, 16), dtype=jnp.float32)
    y_true = jax.random.normal(k2, (2, 4, 16, 16), dtype=jnp.float32)
    loss = jax.block_until_ready(nmse_loss(y_pred, y_true))
    ref = _reference(y_pred, y_true)
    assert jnp.allclose(loss, ref, rtol=1e-5, atol=1e-6), (loss, ref)

    # Ragged / non-lane-aligned shape: exercises the aligned-prefix kernel +
    # wrapper tail correction and the pl.when-gated masked last tile.
    y_pred_r = jax.random.normal(k3, (3, 5, 7, 11), dtype=jnp.float32)
    y_true_r = jax.random.normal(k4, (3, 5, 7, 11), dtype=jnp.float32)
    loss_r = jax.block_until_ready(nmse_loss(y_pred_r, y_true_r, row_tile=8))
    ref_r = _reference(y_pred_r, y_true_r)
    assert jnp.allclose(loss_r, ref_r, rtol=1e-5, atol=1e-6), (loss_r, ref_r)

    # Multi-chunk path (parallel outer axis with per-chunk partial outputs).
    y_pred_c = jax.random.normal(k5, (64, 128), dtype=jnp.float32)
    y_true_c = jax.random.normal(k6, (64, 128), dtype=jnp.float32)
    loss_c = jax.block_until_ready(nmse_loss(y_pred_c, y_true_c, row_tile=8))
    ref_c = _reference(y_pred_c, y_true_c)
    assert jnp.allclose(loss_c, ref_c, rtol=1e-5, atol=1e-6), (loss_c, ref_c)

    # bf16 inputs: dtype-aware sublane tiling (16), f32 accumulation in-kernel.
    y_pred_b = jax.random.normal(k7, (2, 8, 128), dtype=jnp.bfloat16)
    y_true_b = jax.random.normal(k8, (2, 8, 128), dtype=jnp.bfloat16)
    loss_b = jax.block_until_ready(nmse_loss(y_pred_b, y_true_b))
    ref_b = _reference(y_pred_b, y_true_b)
    assert jnp.allclose(loss_b, ref_b, rtol=1e-3, atol=1e-5), (loss_b, ref_b)

    print("KERNEL_OK")
</pallas_src>

<mosaic_0001>
module attributes {stable_mosaic.version = 11 : i64} {
  func.func @_nmse_kernel(%arg0: i32, %arg1: i32, %arg2: memref<16x128xf32, #tpu.memory_space<vmem>>, %arg3: memref<16x128xf32, #tpu.memory_space<vmem>>, %arg4: memref<1x8x128xf32, #tpu.memory_space<vmem>>, %arg5: memref<1x8x128xf32, #tpu.memory_space<vmem>>, %arg6: memref<8x128xf32, #tpu.memory_space<vmem>>, %arg7: memref<8x128xf32, #tpu.memory_space<vmem>>) attributes {dimension_semantics = [#tpu.dimension_semantics<parallel>, #tpu.dimension_semantics<arbitrary>], iteration_bounds = array<i64: 1, 1>, scalar_prefetch = 0 : i64, scratch_operands = 2 : i64, tpu.core_type = #tpu.core_type<tc>, window_params = [{transform_indices = @transform_0, window_bounds = array<i64: 16, 128>}, {transform_indices = @transform_1, window_bounds = array<i64: 16, 128>}, {transform_indices = @transform_2, window_bounds = array<i64: 1, 8, 128>}, {transform_indices = @transform_3, window_bounds = array<i64: 1, 8, 128>}]} {
    %c0_i32 = arith.constant 0 : i32
    %0 = arith.cmpi eq, %arg1, %c0_i32 : i32
    %1 = arith.extui %0 : i1 to i32
    %c0_i32_0 = arith.constant 0 : i32
    %2 = arith.cmpi ne, %1, %c0_i32_0 : i32
    scf.if %2 {
      %cst_15 = arith.constant 0.000000e+00 : f32
      %21 = vector.broadcast %cst_15 : f32 to vector<8x128xf32>
      %c0_16 = arith.constant 0 : index
      %c0_17 = arith.constant 0 : index
      %22 = vector.load %arg6[%c0_16, %c0_17] : memref<8x128xf32, #tpu.memory_space<vmem>>, vector<8x128xf32>
      tpu.vector_store %arg6[%c0_16, %c0_17], %21 {strides = array<i32>} : memref<8x128xf32, #tpu.memory_space<vmem>>, vector<8x128xf32>,
      %cst_18 = arith.constant 0.000000e+00 : f32
      %23 = vector.broadcast %cst_18 : f32 to vector<8x128xf32>
      %c0_19 = arith.constant 0 : index
      %c0_20 = arith.constant 0 : index
      %24 = vector.load %arg7[%c0_19, %c0_20] : memref<8x128xf32, #tpu.memory_space<vmem>>, vector<8x128xf32>
      tpu.vector_store %arg7[%c0_19, %c0_20], %23 {strides = array<i32>} : memref<8x128xf32, #tpu.memory_space<vmem>>, vector<8x128xf32>,
    } else {
    }
    %c0 = arith.constant 0 : index
    %c0_1 = arith.constant 0 : index
    %3 = vector.load %arg2[%c0, %c0_1] : memref<16x128xf32, #tpu.memory_space<vmem>>, vector<16x128xf32>
    %c0_2 = arith.constant 0 : index
    %c0_3 = arith.constant 0 : index
    %4 = vector.load %arg3[%c0_2, %c0_3] : memref<16x128xf32, #tpu.memory_space<vmem>>, vector<16x128xf32>
    %5 = arith.subf %3, %4 : vector<16x128xf32>
    %6 = arith.mulf %5, %5 : vector<16x128xf32>
    %7 = arith.mulf %4, %4 : vector<16x128xf32>
    %c0_4 = arith.constant 0 : index
    %c0_5 = arith.constant 0 : index
    %8 = vector.load %arg6[%c0_4, %c0_5] : memref<8x128xf32, #tpu.memory_space<vmem>>, vector<8x128xf32>
    %9 = vector.shape_cast %6 : vector<16x128xf32> to vector<2x8x128xf32>
    %cst = arith.constant dense<0.000000e+00> : vector<8x128xf32>
    %10 = vector.multi_reduction <add>, %9, %cst [0] : vector<2x8x128xf32> to vector<8x128xf32>
    %11 = arith.addf %8, %10 : vector<8x128xf32>
    %c0_6 = arith.constant 0 : index
    %c0_7 = arith.constant 0 : index
    %12 = vector.load %arg6[%c0_6, %c0_7] : memref<8x128xf32, #tpu.memory_space<vmem>>, vector<8x128xf32>
    tpu.vector_store %arg6[%c0_6, %c0_7], %11 {strides = array<i32>} : memref<8x128xf32, #tpu.memory_space<vmem>>, vector<8x128xf32>,
    %c0_8 = arith.constant 0 : index
    %c0_9 = arith.constant 0 : index
    %13 = vector.load %arg7[%c0_8, %c0_9] : memref<8x128xf32, #tpu.memory_space<vmem>>, vector<8x128xf32>
    %14 = vector.shape_cast %7 : vector<16x128xf32> to vector<2x8x128xf32>
    %cst_10 = arith.constant dense<0.000000e+00> : vector<8x128xf32>
    %15 = vector.multi_reduction <add>, %14, %cst_10 [0] : vector<2x8x128xf32> to vector<8x128xf32>
    %16 = arith.addf %13, %15 : vector<8x128xf32>
    %c0_11 = arith.constant 0 : index
    %c0_12 = arith.constant 0 : index
    %17 = vector.load %arg7[%c0_11, %c0_12] : memref<8x128xf32, #tpu.memory_space<vmem>>, vector<8x128xf32>
    tpu.vector_store %arg7[%c0_11, %c0_12], %16 {strides = array<i32>} : memref<8x128xf32, #tpu.memory_space<vmem>>, vector<8x128xf32>,
    %c0_i32_13 = arith.constant 0 : i32
    %18 = arith.cmpi eq, %arg1, %c0_i32_13 : i32
    %19 = arith.extui %18 : i1 to i32
    %c0_i32_14 = arith.constant 0 : i32
    %20 = arith.cmpi ne, %19, %c0_i32_14 : i32
    scf.if %20 {
      %c0_15 = arith.constant 0 : index
      %c0_16 = arith.constant 0 : index
      %21 = vector.load %arg6[%c0_15, %c0_16] : memref<8x128xf32, #tpu.memory_space<vmem>>, vector<8x128xf32>
      %22 = vector.shape_cast %21 : vector<8x128xf32> to vector<1x8x128xf32>
      %c0_17 = arith.constant 0 : index
      %c0_18 = arith.constant 0 : index
      %c0_19 = arith.constant 0 : index
      %23 = vector.load %arg4[%c0_17, %c0_18, %c0_19] : memref<1x8x128xf32, #tpu.memory_space<vmem>>, vector<1x8x128xf32>
      tpu.vector_store %arg4[%c0_17, %c0_18, %c0_19], %22 {strides = array<i32>} : memref<1x8x128xf32, #tpu.memory_space<vmem>>, vector<1x8x128xf32>,
      %c0_20 = arith.constant 0 : index
      %c0_21 = arith.constant 0 : index
      %24 = vector.load %arg7[%c0_20, %c0_21] : memref<8x128xf32, #tpu.memory_space<vmem>>, vector<8x128xf32>
      %25 = vector.shape_cast %24 : vector<8x128xf32> to vector<1x8x128xf32>
      %c0_22 = arith.constant 0 : index
      %c0_23 = arith.constant 0 : index
      %c0_24 = arith.constant 0 : index
      %26 = vector.load %arg5[%c0_22, %c0_23, %c0_24] : memref<1x8x128xf32, #tpu.memory_space<vmem>>, vector<1x8x128xf32>
      tpu.vector_store %arg5[%c0_22, %c0_23, %c0_24], %25 {strides = array<i32>} : memref<1x8x128xf32, #tpu.memory_space<vmem>>, vector<1x8x128xf32>,
    } else {
    }
    return
  }
  func.func @transform_0(%arg0: i32, %arg1: i32) -> (i32, i32) {
    %c1_i32 = arith.constant 1 : i32
    %0 = arith.muli %arg0, %c1_i32 : i32
    %1 = arith.addi %0, %arg1 : i32
    %c0_i32 = arith.constant 0 : i32
    %2 = arith.minsi %1, %c0_i32 : i32
    %c0_i32_0 = arith.constant 0 : i32
    %c0_i32_1 = arith.constant 0 : i32
    return %2, %c0_i32_0 : i32, i32
  }
  func.func @transform_1(%arg0: i32, %arg1: i32) -> (i32, i32) {
    %c1_i32 = arith.constant 1 : i32
    %0 = arith.muli %arg0, %c1_i32 : i32
    %1 = arith.addi %0, %arg1 : i32
    %c0_i32 = arith.constant 0 : i32
    %2 = arith.minsi %1, %c0_i32 : i32
    %c0_i32_0 = arith.constant 0 : i32
    %c0_i32_1 = arith.constant 0 : i32
    return %2, %c0_i32_0 : i32, i32
  }
  func.func @transform_2(%arg0: i32, %arg1: i32) -> (i32, i32, i32) {
    %c0_i32 = arith.constant 0 : i32
    %c0_i32_0 = arith.constant 0 : i32
    %c0_i32_1 = arith.constant 0 : i32
    return %arg0, %c0_i32, %c0_i32_0 : i32, i32, i32
  }
  func.func @transform_3(%arg0: i32, %arg1: i32) -> (i32, i32, i32) {
    %c0_i32 = arith.constant 0 : i32
    %c0_i32_0 = arith.constant 0 : i32
    %c0_i32_1 = arith.constant 0 : i32
    return %arg0, %c0_i32, %c0_i32_0 : i32, i32, i32
  }
}

</mosaic_0001>

<bundles_post_ra>
// kernel: tpu_custom_call.1
= control target key start
LH: loop header
LB: loop body
LE: loop exit
PB: predicated region body
PF: predicated region fallthrough
CT: control target
= control target key end

     0   :  { %9 = vsyncpa [#allocation5], 0  ;;  %s284_s0 = inlined_call_operand.hbm [shape: f32[16,128], index: 0, kind: input, shape index: {}]   ;;  %s285_s1 = inlined_call_operand.hbm [shape: f32[16,128], index: 1, kind: input, shape index: {}]   ;;  %s286_s2 = inlined_call_operand.hbm [shape: f32[1,8,128], index: 2, kind: output, shape index: {0}]   ;;  %s287_s3 = inlined_call_operand.hbm [shape: f32[1,8,128], index: 3, kind: output, shape index: {1}]  }
   0x1   :  { %10 = vsyncpa [#allocation8], 0 }
   0x2   :  { %11 = vsyncpa [#allocation6], 0 }
   0x3   :  { %12 = vsyncpa [#allocation11], 0  ;;  %s23_s14 = sshll.u32 %s284_s0, 4  ;;  %s246_s15 = smov [#allocation4]   ;;  %s24_s14 = int_to_ptr.hbm [resolvable:$true] %s23_s14 }
   0x4   :  { %s25_s16 = sshll.u32 %s246_s15, 4  ;;  %s42_s19 = sshll.u32 %s285_s1, 4  ;;  %s26_s16 = int_to_ptr.vmem [resolvable:$true] %s25_s16  ;;  %s43_s19 = int_to_ptr.hbm [resolvable:$true] %s42_s19 }
   0x5   :  { %s247_s20 = smov 128   ;;  %s248_s21 = smov 8  }
   0x6   :  { %31 = dma.hbm_to_vmem [thread:$0]  %s24_s14, 256, %s26_s16, [#allocation5], %s247_s20, %s247_s20, %s248_s21  }
   0x7   :  { %s249_s22 = smov [#allocation7]  }
   0x8   :  { %s44_s23 = sshll.u32 %s249_s22, 4  ;;  %s45_s23 = int_to_ptr.vmem [resolvable:$true] %s44_s23 }
   0x9   :  { %50 = dma.hbm_to_vmem [thread:$0]  %s43_s19, 256, %s45_s23, [#allocation8], %s247_s20, %s247_s20, %s248_s21  }
   0xa   :  { %238 = dma.done.wait [#allocation5], 256  }
   0xb   :  { %239 = vsyncadd [#allocation5], 4294967040 }
   0xc   :  { %240 = dma.done.wait [#allocation8], 256  }
   0xd   :  { %241 = vsyncadd [#allocation8], 4294967040  ;;  %v73_v0 = vld [vmem:[#allocation4] sm:$0xff]  ;;  %v74_v1 = vld [vmem:[#allocation4 + $0x8] sm:$0xff]  ;;  %s250_s0 = smov [#allocation10]   ;;  %s116_s26 = sshll.u32 %s287_s3, 4  ;;  %s117_s26 = int_to_ptr.hbm [resolvable:$true] %s116_s26 }
   0xe   :  { %v75_v2 = vld [vmem:[#allocation7] sm:$0xff]  ;;  %v76_v3 = vld [vmem:[#allocation7 + $0x8] sm:$0xff]  ;;  %s114_s1 = sshll.u32 %s250_s0, 4  ;;  %s251_s27 = smov [#allocation9]   ;;  %s115_s1 = int_to_ptr.vmem [resolvable:$true] %s114_s1 }
   0xf   :  { %v77_v4 = vsub.f32 %v73_v0, %v75_v2  ;;  %v81_v5 = vmul.f32 %v75_v2, %v75_v2  ;;  %v78_v6 = vsub.f32 %v74_v1, %v76_v3  ;;  %v82_v7 = vmul.f32 %v76_v3, %v76_v3  ;;  %s103_s28 = sshll.u32 %s251_s27, 4  ;;  %s105_s4 = sshll.u32 %s286_s2, 4  ;;  %s104_s28 = int_to_ptr.vmem [resolvable:$true] %s103_s28  ;;  %s106_s4 = int_to_ptr.hbm [resolvable:$true] %s105_s4 }
  0x11   :  { %v79_v8 = vmul.f32 %v77_v4, %v77_v4  ;;  %v80_v9 = vmul.f32 %v78_v6, %v78_v6  ;;  %v88_v10 = vadd.f32 %v82_v7, %v81_v5 }
  0x13   :  { %v84_v11 = vadd.f32 %v80_v9, %v79_v8  ;;  %97 = vst [vmem:[#allocation10] sm:$0xff] %v88_v10 }
  0x14   :  { %119 = dma.vmem_to_hbm [thread:$0]  %s115_s1, 128, %s117_s26, [#allocation11]  }
  0x15   :  { %95 = vst [vmem:[#allocation9] sm:$0xff] %v84_v11 }
  0x16   :  { %108 = dma.vmem_to_hbm [thread:$0]  %s104_s28, 128, %s106_s4, [#allocation6]  }
  0x17   :  { %242 = dma.done.wait [#allocation6], 128  }
  0x18   :  { %243 = vsyncadd [#allocation6], 4294967168 }
  0x19   :  { %244 = dma.done.wait [#allocation11], 128  }
  0x1a   :  { %245 = vsyncadd [#allocation11], 4294967168 }
  0x1b   :  { %128 = vsyncpa [#allocation5], 1 }
  0x1c   :  { %129 = vsyncpa [#allocation8], 1 }
  0x1d   :  { %130 = vsyncpa [#allocation6], 1 }
  0x1e   :  { %131 = vsyncpa [#allocation11], 1 }

</bundles_post_ra>
